<compile_context>
chip_gen: v7x
topology: tpu7x:2x2x1
jax: 0.10.0
libtpu: 0.0.40
codegen_flags: <defaults>
</compile_context>

<pallas_src>
import math

import jax
import jax.numpy as jnp
from jax import lax
from jax.experimental import pallas as pl
from jax.experimental.pallas import tpu as pltpu


def _fused_linear2_silu_mul_kernel(x_ref, w1_ref, w2_ref, o_ref,
                                   acc1_ref, acc2_ref):
    k = pl.program_id(2)

    @pl.when(k == 0)
    def _init():
        acc1_ref[...] = jnp.zeros_like(acc1_ref)
        acc2_ref[...] = jnp.zeros_like(acc2_ref)

    x = x_ref[...]
    # torch.nn.Linear weight is (out_features, in_features) = (N, K);
    # contract K of x with K of W (transposed-RHS matmul, MXU-native).
    dn = (((1,), (1,)), ((), ()))
    acc1_ref[...] += lax.dot_general(x, w1_ref[...], dn,
                                     preferred_element_type=jnp.float32)
    acc2_ref[...] += lax.dot_general(x, w2_ref[...], dn,
                                     preferred_element_type=jnp.float32)

    @pl.when(k == pl.num_programs(2) - 1)
    def _finalize():
        a = acc1_ref[...]
        gated = a * jax.nn.sigmoid(a)            # SiLU in fp32
        o_ref[...] = (gated * acc2_ref[...]).astype(o_ref.dtype)


def linear2_silu_mul(x, w1, w2, *, tm=256, tn=256, tk=512, out_dtype=None):
    """Computes silu(x @ w1.T) * (x @ w2.T).

    x : (..., K)
    w1, w2 : (N, K)  -- torch.nn.Linear weight layout, no bias.
    """
    orig_shape = x.shape
    K = orig_shape[-1]
    N = w1.shape[0]
    assert w1.shape == (N, K) and w2.shape == (N, K)
    M = int(math.prod(orig_shape[:-1])) if len(orig_shape) > 1 else 1
    x2d = x.reshape(M, K)

    out_dtype = out_dtype or x.dtype

    # Clamp tile sizes to the problem; N/K tiles must divide the weight dims.
    tm = min(tm, M)
    tn = min(tn, N)
    tk = min(tk, K)
    assert N % tn == 0, "out_features must be divisible by the N tile"
    assert K % tk == 0, "in_features must be divisible by the K tile"

    # Pad rows so the (possibly ragged) batch*seq divides the row tile.
    m_pad = (-M) % tm
    if m_pad:
        x2d = jnp.pad(x2d, ((0, m_pad), (0, 0)))
    Mp = M + m_pad

    grid = (Mp // tm, N // tn, K // tk)

    out2d = pl.pallas_call(
        _fused_linear2_silu_mul_kernel,
        out_shape=jax.ShapeDtypeStruct((Mp, N), out_dtype),
        grid_spec=pltpu.PrefetchScalarGridSpec(
            num_scalar_prefetch=0,
            grid=grid,
            in_specs=[
                pl.BlockSpec((tm, tk), lambda i, j, k: (i, k)),   # x
                pl.BlockSpec((tn, tk), lambda i, j, k: (j, k)),   # W1
                pl.BlockSpec((tn, tk), lambda i, j, k: (j, k)),   # W2
            ],
            out_specs=pl.BlockSpec((tm, tn), lambda i, j, k: (i, j)),
            scratch_shapes=[
                pltpu.VMEM((tm, tn), jnp.float32),   # acc for linear_1 path
                pltpu.VMEM((tm, tn), jnp.float32),   # acc for linear_2 path
            ],
        ),
        compiler_params=pltpu.CompilerParams(
            dimension_semantics=("parallel", "parallel", "arbitrary"),
        ),
    )(x2d, w1, w2)

    if m_pad:
        out2d = out2d[:M]
    return out2d.reshape(orig_shape[:-1] + (N,))


if __name__ == "__main__":
    # Small shapes consistent with the module's forward (the real module uses
    # 4096x4096 Linear layers; the wrapper handles that shape unchanged).
    batch, seq, hidden = 2, 8, 512

    key = jax.random.PRNGKey(0)
    kx, k1, k2 = jax.random.split(key, 3)

    x = jax.random.normal(kx, (batch, seq, hidden), dtype=jnp.float32)

    # torch.nn.Linear default init: U(-1/sqrt(in_features), +1/sqrt(in_features))
    bound = 1.0 / math.sqrt(hidden)
    w1 = jax.random.uniform(k1, (hidden, hidden), jnp.float32, -bound, bound)
    w2 = jax.random.uniform(k2, (hidden, hidden), jnp.float32, -bound, bound)

    out = linear2_silu_mul(x, w1, w2)
    out = jax.block_until_ready(out)

    # Pure-JAX reference mirroring the PyTorch forward.
    y1 = x @ w1.T
    y2 = x @ w2.T
    ref = (y1 * jax.nn.sigmoid(y1)) * y2

    assert out.shape == ref.shape and out.dtype == ref.dtype
    assert jnp.allclose(out, ref, atol=1e-4, rtol=1e-4)

    print("KERNEL_OK")
</pallas_src>

<mosaic_0001>
module attributes {stable_mosaic.version = 11 : i64} {
  func.func @_fused_linear2_silu_mul_kernel(%arg0: i32, %arg1: i32, %arg2: i32, %arg3: memref<16x512xf32, #tpu.memory_space<vmem>>, %arg4: memref<256x512xf32, #tpu.memory_space<vmem>>, %arg5: memref<256x512xf32, #tpu.memory_space<vmem>>, %arg6: memref<16x256xf32, #tpu.memory_space<vmem>>, %arg7: memref<16x256xf32, #tpu.memory_space<vmem>>, %arg8: memref<16x256xf32, #tpu.memory_space<vmem>>) attributes {dimension_semantics = [#tpu.dimension_semantics<parallel>, #tpu.dimension_semantics<parallel>, #tpu.dimension_semantics<arbitrary>], iteration_bounds = array<i64: 1, 2, 1>, scalar_prefetch = 0 : i64, scratch_operands = 2 : i64, tpu.core_type = #tpu.core_type<tc>, window_params = [{transform_indices = @transform_0, window_bounds = array<i64: 16, 512>}, {transform_indices = @transform_1, window_bounds = array<i64: 256, 512>}, {transform_indices = @transform_2, window_bounds = array<i64: 256, 512>}, {transform_indices = @transform_3, window_bounds = array<i64: 16, 256>}]} {
    %c0_i32 = arith.constant 0 : i32
    %0 = arith.cmpi eq, %arg2, %c0_i32 : i32
    %1 = arith.extui %0 : i1 to i32
    %c0_i32_0 = arith.constant 0 : i32
    %2 = arith.cmpi ne, %1, %c0_i32_0 : i32
    scf.if %2 {
      %cst_17 = arith.constant 0.000000e+00 : f32
      %17 = vector.broadcast %cst_17 : f32 to vector<16x256xf32>
      %c0_18 = arith.constant 0 : index
      %c0_19 = arith.constant 0 : index
      %18 = vector.load %arg7[%c0_18, %c0_19] : memref<16x256xf32, #tpu.memory_space<vmem>>, vector<16x256xf32>
      tpu.vector_store %arg7[%c0_18, %c0_19], %17 {strides = array<i32>} : memref<16x256xf32, #tpu.memory_space<vmem>>, vector<16x256xf32>,
      %cst_20 = arith.constant 0.000000e+00 : f32
      %19 = vector.broadcast %cst_20 : f32 to vector<16x256xf32>
      %c0_21 = arith.constant 0 : index
      %c0_22 = arith.constant 0 : index
      %20 = vector.load %arg8[%c0_21, %c0_22] : memref<16x256xf32, #tpu.memory_space<vmem>>, vector<16x256xf32>
      tpu.vector_store %arg8[%c0_21, %c0_22], %19 {strides = array<i32>} : memref<16x256xf32, #tpu.memory_space<vmem>>, vector<16x256xf32>,
    } else {
    }
    %c0 = arith.constant 0 : index
    %c0_1 = arith.constant 0 : index
    %3 = vector.load %arg3[%c0, %c0_1] : memref<16x512xf32, #tpu.memory_space<vmem>>, vector<16x512xf32>
    %c0_2 = arith.constant 0 : index
    %c0_3 = arith.constant 0 : index
    %4 = vector.load %arg7[%c0_2, %c0_3] : memref<16x256xf32, #tpu.memory_space<vmem>>, vector<16x256xf32>
    %c0_4 = arith.constant 0 : index
    %c0_5 = arith.constant 0 : index
    %5 = vector.load %arg4[%c0_4, %c0_5] : memref<256x512xf32, #tpu.memory_space<vmem>>, vector<256x512xf32>
    %cst = arith.constant dense<0.000000e+00> : vector<16x256xf32>
    %6 = tpu.matmul %3, %5, %cst {dimension_numbers = #tpu.dot_dimension_numbers<[1], [1], [0], [0], [0, 0, 1, 0], [], []>} : vector<16x512xf32>, vector<256x512xf32>, vector<16x256xf32> -> vector<16x256xf32>
    %7 = arith.addf %4, %6 : vector<16x256xf32>
    %c0_6 = arith.constant 0 : index
    %c0_7 = arith.constant 0 : index
    %8 = vector.load %arg7[%c0_6, %c0_7] : memref<16x256xf32, #tpu.memory_space<vmem>>, vector<16x256xf32>
    tpu.vector_store %arg7[%c0_6, %c0_7], %7 {strides = array<i32>} : memref<16x256xf32, #tpu.memory_space<vmem>>, vector<16x256xf32>,
    %c0_8 = arith.constant 0 : index
    %c0_9 = arith.constant 0 : index
    %9 = vector.load %arg8[%c0_8, %c0_9] : memref<16x256xf32, #tpu.memory_space<vmem>>, vector<16x256xf32>
    %c0_10 = arith.constant 0 : index
    %c0_11 = arith.constant 0 : index
    %10 = vector.load %arg5[%c0_10, %c0_11] : memref<256x512xf32, #tpu.memory_space<vmem>>, vector<256x512xf32>
    %cst_12 = arith.constant dense<0.000000e+00> : vector<16x256xf32>
    %11 = tpu.matmul %3, %10, %cst_12 {dimension_numbers = #tpu.dot_dimension_numbers<[1], [1], [0], [0], [0, 0, 1, 0], [], []>} : vector<16x512xf32>, vector<256x512xf32>, vector<16x256xf32> -> vector<16x256xf32>
    %12 = arith.addf %9, %11 : vector<16x256xf32>
    %c0_13 = arith.constant 0 : index
    %c0_14 = arith.constant 0 : index
    %13 = vector.load %arg8[%c0_13, %c0_14] : memref<16x256xf32, #tpu.memory_space<vmem>>, vector<16x256xf32>
    tpu.vector_store %arg8[%c0_13, %c0_14], %12 {strides = array<i32>} : memref<16x256xf32, #tpu.memory_space<vmem>>, vector<16x256xf32>,
    %c0_i32_15 = arith.constant 0 : i32
    %14 = arith.cmpi eq, %arg2, %c0_i32_15 : i32
    %15 = arith.extui %14 : i1 to i32
    %c0_i32_16 = arith.constant 0 : i32
    %16 = arith.cmpi ne, %15, %c0_i32_16 : i32
    scf.if %16 {
      %c0_17 = arith.constant 0 : index
      %c0_18 = arith.constant 0 : index
      %17 = vector.load %arg7[%c0_17, %c0_18] : memref<16x256xf32, #tpu.memory_space<vmem>>, vector<16x256xf32>
      %18 = arith.negf %17 : vector<16x256xf32>
      %19 = math.exp %18 : vector<16x256xf32>
      %cst_19 = arith.constant 1.000000e+00 : f32
      %20 = vector.broadcast %cst_19 : f32 to vector<16x256xf32>
      %21 = arith.addf %20, %19 : vector<16x256xf32>
      %22 = arith.divf %20, %21 : vector<16x256xf32>
      %23 = arith.mulf %17, %22 : vector<16x256xf32>
      %c0_20 = arith.constant 0 : index
      %c0_21 = arith.constant 0 : index
      %24 = vector.load %arg8[%c0_20, %c0_21] : memref<16x256xf32, #tpu.memory_space<vmem>>, vector<16x256xf32>
      %25 = arith.mulf %23, %24 : vector<16x256xf32>
      %c0_22 = arith.constant 0 : index
      %c0_23 = arith.constant 0 : index
      %26 = vector.load %arg6[%c0_22, %c0_23] : memref<16x256xf32, #tpu.memory_space<vmem>>, vector<16x256xf32>
      tpu.vector_store %arg6[%c0_22, %c0_23], %25 {strides = array<i32>} : memref<16x256xf32, #tpu.memory_space<vmem>>, vector<16x256xf32>,
    } else {
    }
    return
  }
  func.func @transform_0(%arg0: i32, %arg1: i32, %arg2: i32) -> (i32, i32) {
    %c0_i32 = arith.constant 0 : i32
    return %arg0, %arg2 : i32, i32
  }
  func.func @transform_1(%arg0: i32, %arg1: i32, %arg2: i32) -> (i32, i32) {
    %c0_i32 = arith.constant 0 : i32
    return %arg1, %arg2 : i32, i32
  }
  func.func @transform_2(%arg0: i32, %arg1: i32, %arg2: i32) -> (i32, i32) {
    %c0_i32 = arith.constant 0 : i32
    return %arg1, %arg2 : i32, i32
  }
  func.func @transform_3(%arg0: i32, %arg1: i32, %arg2: i32) -> (i32, i32) {
    %c0_i32 = arith.constant 0 : i32
    return %arg0, %arg1 : i32, i32
  }
}

</mosaic_0001>

<bundles_post_ra>
// kernel: tpu_custom_call.1
= control target key start
LH: loop header
LB: loop body
LE: loop exit
PB: predicated region body
PF: predicated region fallthrough
CT: control target
= control target key end

     0   :  { %8 = vsyncpa [#allocation5], 0  ;;  %s2226_s0 = inlined_call_operand.hbm [shape: f32[16,512], index: 0, kind: input, shape index: {}]   ;;  %s2227_s1 = inlined_call_operand.hbm [shape: f32[512,512], index: 1, kind: input, shape index: {}]   ;;  %s2228_s2 = inlined_call_operand.hbm [shape: f32[512,512], index: 2, kind: input, shape index: {}]   ;;  %s2229_s3 = inlined_call_operand.hbm [shape: f32[16,512], index: 3, kind: output, shape index: {}]  }
   0x1   :  { %9 = vsyncpa [#allocation8], 0 }
   0x2   :  { %11 = vsyncpa [#allocation8 + $0x1], 0 }
   0x3   :  { %12 = vsyncpa [#allocation6], 0 }
   0x4   :  { %14 = vsyncpa [#allocation6 + $0x1], 0  ;;  %s1695_s12 = smov 0   ;;  %s1697_s13 = smov 0  }
   0x5   :  { %s1699_s14 = smov 0   ;;  %s1701_s15 = smov 0  }
   0x6   :  { %s1703_s16 = smov 0   ;;  %s1705_s17 = smov 0  }
   0x7 LB: > { %s35_s18 = sadd.s32 1, %s1660_s16  ;;  %s76_s19 = sadd.s32 1, %s1652_s14  ;;  %s1664_s17 = sphi %s1705_s17, %s20_s17   ;;  %s1660_s16 = sphi %s1703_s16, %s2254_s16   ;;  %s1656_s15 = sphi %s1701_s15, %s2253_s15   ;;  %s1652_s14 = sphi %s1699_s14, %s2252_s14   ;;  %s1648_s13 = sphi %s1697_s13, %s2251_s13   ;;  %s1644_s12 = sphi %s1695_s12, %s2250_s12  }
   0x8   : > { %p37_p0 = scmp.ge.s32.totalorder %s35_s18, 2  ;;  %p83_p1 = scmp.ne.s32.totalorder %s1652_s14, %s1648_s13 }
   0x9   : > { %p84_p2 = scmp.eq.s32.totalorder %s1664_s17, 0  ;;  %p1417_p6 = scmp.lt.s32.totalorder %s1664_s17, 2 }
   0xa   : > { %s2256_s18 = smov (%p37_p0, %s35_s18), 0  ;;  %s188_s22 = sand.u32 1, %s1664_s17  }
   0xb   : > { %p1735_p3 = por %p84_p2, %p83_p1  ;;  %s71_s21 = ssub.s32 %s1660_s16, %s2256_s18 }
   0xc   : > { %p74_p5 = scmp.eq.s32.totalorder %s71_s21, 0  ;;  %s190_s23 = sand.u32 1, %s1652_s14  }
   0xd   : > { %s1748_s25 = sshll.u32 %s190_s23, 10  ;;  %s1123_s26 = sshll.u32 %s1660_s16, 14 }
   0xe   : > { %s1746_s24 = scalar_select %p74_p5, %s1652_s14, %s76_s19  }
   0xf   : > { %s1754_s29 = scalar_lea.hbm %s2227_s1, %s1123_s26  ;;  %s192_s30 = scalar_lea.vmem [#allocation7], %s1748_s25 }
  0x10   : > { %s202_s4 = sshll.u32 %s192_s30, 4  ;;  %p1761_p7 = pnand %p1417_p6, %p1735_p3  ;;  %s1757_s4 = int_to_ptr.vmem [resolvable:$true] %s202_s4 }
  0x11   : > { %s1768_s8 = scalar_lea.hbm %s2228_s2, %s1123_s26  ;;  %s1770_s9 = scalar_lea.sflag [#allocation8], %s188_s22 }
  0x12   : > { %s1490_s10 = scalar_lea.hbm %s1754_s29, 16384  ;;  %p1492_p9 = pneg %p1761_p7 }
  0x13   : > { %p1491_p8 = scmp.ne.s32.totalorder %s1754_s29, %s1490_s10  ;;  %s1495_s20 = scalar_lea.hbm %s2227_s1, 32768 }
  0x14   : > { %p1496_p12 = scmp.lt.u32.totalorder %s1754_s29, %s2227_s1  ;;  %p1497_p13 = scmp.lt.u32.totalorder %s1495_s20, %s1490_s10 }
  0x15   : > { %p1493_p10 = pnand %p1492_p9, %p1491_p8  ;;  %p1499_p2 = scmp.lt.u32.totalorder %s1490_s10, %s1754_s29 }
  0x16   : > { %p1498_p0 = por %p1497_p13, %p1496_p12 }
  0x17   : > { %p1494_p11 = pneg %p1493_p10 }
  0x18   : > { %p1500_p3 = por %p1499_p2, %p1498_p0 }
  0x1a   : > { %p1501_p5 = pnand %p1500_p3, %p1494_p11 }
  0x1c   : > { %1504 = shalt.err (!%p1501_p5)
}
  0x1d   : > { %s1505_s22 = scalar_lea.vmem %s1757_s4, 16384  ;;  %s1666_s26 = smov [#allocation7]  }
  0x1e   : > { %p1506_p6 = scmp.ne.s32.totalorder %s1757_s4, %s1505_s22  ;;  %s1510_s27 = sshll.u32 %s1666_s26, 4  ;;  %s1511_s27 = int_to_ptr.vmem [resolvable:$false] %s1510_s27 }
  0x1f   : > { %s1512_s28 = scalar_lea.vmem %s1511_s27, 32768  ;;  %p1513_p4 = scmp.lt.s32.totalorder %s1757_s4, %s1511_s27 }
  0x20   : > { %p1508_p8 = pnand %p1506_p6, %p1492_p9  ;;  %p1514_p12 = scmp.lt.s32.totalorder %s1512_s28, %s1505_s22 }
  0x22   : > { %p1509_p10 = pneg %p1508_p8  ;;  %p1515_p13 = por %p1514_p12, %p1513_p4 }
  0x24   : > { %p1516_p0 = pnand %p1515_p13, %p1509_p10 }
  0x26   : > { %1519 = shalt.err (!%p1516_p0)
}
  0x27   : > { %s1667_s30 = smov 512   ;;  %s1668_s6 = smov 32  }
  0x28   : > { %1408 = dma.hbm_to_vmem [thread:$0]  (!%p1761_p7), %s1754_s29, 16384, %s1757_s4, %s1770_s9, %s1667_s30, %s1667_s30, %s1668_s6  }
  0x29   : > { %s216_s7 = scalar_lea.vmem [#allocation9], %s1748_s25  ;;  %s1803_s11 = sadd.s32 4294967295, %s1664_s17  }
  0x2a   : > { %s226_s10 = sshll.u32 %s216_s7, 4  ;;  %s1096_s19 = sadd.s32 4294967294, %s1664_s17   ;;  %s1829_s10 = int_to_ptr.vmem [resolvable:$true] %s226_s10 }
  0x2b   : > { %p89_p4 = scmp.ne.s32.totalorder %s1648_s13, %s1644_s12  ;;  %p2230_p11 = scmp.eq.s32.totalorder %s1803_s11, 0 }
  0x2c   : > { %p143_p2 = scmp.eq.s32.totalorder %s1803_s11, 1  ;;  %p149_p3 = scmp.eq.s32.totalorder %s1096_s19, 1 }
  0x2d   : > { %p1097_p5 = scmp.ge.s32.totalorder %s1664_s17, 1  ;;  %p1813_p6 = por %p2230_p11, %p89_p4 }
  0x2e   : > { %p1820_p8 = por %p143_p2, %p83_p1  ;;  %p1824_p10 = por %p149_p3, %p89_p4 }
  0x2f   : > { %s2236_s29 = scalar_select %p1813_p6, 1, 0 }
  0x30   : > { %s2237_s25 = scalar_select %p1820_p8, 1, 0 }
  0x31   : > { %s2238_s4 = scalar_select %p1824_p10, 1, 0 }
  0x32   : > { %p156_p12 = scmp.lt.s32.totalorder %s1664_s17, 3  ;;  %s1669_s21 = smov [#allocation4]  }
  0x33   : > { %s1835_s23 = sshll.u32 %s1669_s21, 4  ;;  %s1520_s22 = scalar_lea.hbm %s1768_s8, 16384  ;;  %s175_s23 = int_to_ptr.vmem [resolvable:$true] %s1835_s23 }
  0x34   : > { %p1831_p13 = pnand %p1097_p5, %p156_p12  ;;  %p1521_p0 = scmp.ne.s32.totalorder %s1768_s8, %s1520_s22 }
  0x35   : > { %s1525_s28 = scalar_lea.hbm %s2228_s2, 32768  ;;  %p1526_p3 = scmp.lt.u32.totalorder %s1768_s8, %s2228_s2 }
  0x36   : > { %s2239_s20 = scalar_select %p1831_p13, 1, 0 }
  0x37   : > { %p1523_p4 = pnand %p1521_p0, %p1492_p9  ;;  %p1527_p5 = scmp.lt.u32.totalorder %s1525_s28, %s1520_s22 }
  0x38   : > { %p1529_p11 = scmp.lt.u32.totalorder %s1520_s22, %s1768_s8 }
  0x39   : > { %p1524_p2 = pneg %p1523_p4  ;;  %p1528_p12 = por %p1527_p5, %p1526_p3 }
  0x3b   : > { %p1530_p10 = por %p1529_p11, %p1528_p12 }
  0x3d   : > { %p1531_p8 = pnand %p1530_p10, %p1524_p2 }
  0x3f   : > { %1534 = shalt.err (!%p1531_p8)
}
  0x40   : > { %s1535_s21 = scalar_lea.vmem %s1829_s10, 16384  ;;  %s1670_s26 = smov [#allocation9]  }
  0x41   : > { %p1536_p0 = scmp.ne.s32.totalorder %s1829_s10, %s1535_s21  ;;  %s1540_s27 = sshll.u32 %s1670_s26, 4  ;;  %s1541_s27 = int_to_ptr.vmem [resolvable:$false] %s1540_s27 }
  0x42   : > { %s1542_s7 = scalar_lea.vmem %s1541_s27, 32768  ;;  %p1543_p6 = scmp.lt.s32.totalorder %s1829_s10, %s1541_s27 }
  0x43   : > { %p1538_p4 = pnand %p1536_p0, %p1492_p9  ;;  %p1544_p3 = scmp.lt.s32.totalorder %s1542_s7, %s1535_s21 }
  0x45   : > { %p1539_p1 = pneg %p1538_p4  ;;  %p1545_p5 = por %p1544_p3, %p1543_p6 }
  0x47   : > { %p1546_p11 = pnand %p1545_p5, %p1539_p1 }
  0x49   : > { %1549 = shalt.err (!%p1546_p11)
}
  0x4a   : > { %1411 = dma.hbm_to_vmem [thread:$0]  (!%p1761_p7), %s1768_s8, 16384, %s1829_s10, %s1770_s9, %s1667_s30, %s1667_s30, %s1668_s6  }
  0x4b   : > { %p2240_p9 = scmp.eq.s32.totalorder %s1803_s11, 0  ;;  %p2241_p8 = pneg %p1831_p13 }
  0x4c   : > { %s1550_s19 = scalar_lea.hbm %s2226_s0, 1024 }
  0x4d   : > { %p1872_p10 = pnand %p2241_p8, %p2240_p9  ;;  %p1551_p6 = scmp.ne.s32.totalorder %s2226_s0, %s1550_s19 }
  0x4e   : > { %p1557_p12 = scmp.lt.u32.totalorder %s1550_s19, %s2226_s0 }
  0x4f   : > { %p1552_p1 = pneg %p1872_p10 }
  0x51   : > { %p1553_p7 = pnand %p1552_p1, %p1551_p6 }
  0x53   : > { %p1554_p2 = pneg %p1553_p7 }
  0x55   : > { %p1559_p0 = pnand %p1557_p12, %p1554_p2 }
  0x57   : > { %1562 = shalt.err (!%p1559_p0)
}
  0x58   : > { %s1563_s10 = scalar_lea.vmem %s175_s23, 1024  ;;  %p1571_p11 = scmp.lt.s32.totalorder %s175_s23, %s175_s23 }
  0x59   : > { %p1564_p4 = scmp.ne.s32.totalorder %s175_s23, %s1563_s10  ;;  %p1572_p9 = scmp.lt.s32.totalorder %s1563_s10, %s1563_s10 }
  0x5b   : > { %p1566_p3 = pnand %p1564_p4, %p1552_p1  ;;  %p1573_p8 = por %p1572_p9, %p1571_p11 }
  0x5d   : > { %p1567_p5 = pneg %p1566_p3 }
  0x5f   : > { %p1574_p13 = pnand %p1573_p8, %p1567_p5 }
  0x61   : > { %1577 = shalt.err (!%p1574_p13)
}
  0x62   : > { %1404 = dma.hbm_to_vmem [thread:$0]  (!%p1872_p10), %s2226_s0, 1024, %s175_s23, [#allocation5], %s1667_s30, %s1667_s30, %s1668_s6  }
  0x63   : > { %p2243_p6 = scmp.ne.s32.totalorder %s2239_s20, 0 }
  0x64   : > { %p2244_p1 = scmp.eq.s32.totalorder (!%p2243_p6), %s1803_s11, 0 }
  0x65   : > { %238 = sbr.rel (%p2243_p6) target bundleno = 637 (0x27d), region = 32 }
  0x6c   : > { %1631 = dma.done.wait (%p2244_p1), [#allocation5], 1024   ;;  %p2245_p7 = pmov %p2244_p1 }
  0x6d   : > { %s244_s22 = sand.u32 1, %s1803_s11   ;;  %s1903_s28 = sand.u32 1, %s1648_s13  }
  0x6e   : > { %1633 = vsyncadd (%p2245_p7), [#allocation5], 4294966272  ;;  %s1110_s5 = sshll.u32 %s1903_s28, 10  ;;  %s245_s19 = scalar_lea.sflag [#allocation8], %s244_s22 }
  0x6f   : > { %s1906_s21 = scalar_lea.vmem [#allocation7], %s1110_s5  ;;  %p2246_p13 = scmp.ne.s32.totalorder %s2236_s29, 0 }
  0x71   : > { %1635 = dma.done.wait (%p2246_p13), %s245_s19, 32768  }
  0x72   : > { %1637 = vsyncadd (%p2246_p13), %s245_s19, 4294934528  ;;  %v318_v0 = vld [vmem:[%s1906_s21 + $0x8] sm:$0xff]  ;;  %s1914_s30 = scalar_lea.vmem [#allocation9], %s1110_s5  ;;  %v317_v5 = vld [vmem:[%s1906_s21] sm:$0xff]  ;;  %s1112_s6 = sshll.u32 %s1903_s28, 5 }
  0x73   : > { %v322_v1 = vld [vmem:[%s1906_s21 + $0x28] sm:$0xff]  ;;  %v321_v6 = vld [vmem:[%s1906_s21 + $0x20] sm:$0xff]  ;;  %s284_s11 = scalar_lea.vmem [#allocation10], %s1112_s6  ;;  %s1126_s20 = sshll.u32 %s1656_s15, 8 }
  0x74   : > { %v612_v2 = vld [vmem:[%s1914_s30 + $0x8] sm:$0xff]  ;;  %v1127_v3 = vpack.c.bf16 %v322_v1, %v318_v0  ;;  %v1129_v8 = vpack.c.bf16 %v321_v6, %v317_v5  ;;  %v611_v9 = vld [vmem:[%s1914_s30] sm:$0xff]  ;;  %s965_s29 = sshll.u32 %s284_s11, 4  ;;  %s2177_s8 = scalar_lea.hbm %s2229_s3, %s1126_s20  ;;  %s2172_s29 = int_to_ptr.vmem [resolvable:$true] %s965_s29 }
  0x75   : > { %v616_v4 = vld [vmem:[%s1914_s30 + $0x28] sm:$0xff]  ;;  %v615_v10 = vld [vmem:[%s1914_s30 + $0x20] sm:$0xff]  ;;  %s949_s15 = scalar_lea.sflag [#allocation6], %s1903_s28  ;;  %s1578_s9 = scalar_lea.vmem %s2172_s29, 512 }
  0x76   : > { %v1255_v7 = vpack.c.bf16 %v616_v4, %v612_v2  ;;  %v326_v11 = vld [vmem:[%s1906_s21 + $0x48] sm:$0xff]  ;;  %1128 = vmatprep.subr.bf16.mxu0 %v1127_v3  ;;  %v1257_v12 = vpack.c.bf16 %v615_v10, %v611_v9  ;;  %v325_v18 = vld [vmem:[%s1906_s21 + $0x40] sm:$0xff]  ;;  %p1579_p10 = scmp.ne.s32.totalorder %s2172_s29, %s1578_s9  ;;  %p2247_p2 = scmp.ne.s32.totalorder %s2237_s25, 0 }
  0x77   : > { %v330_v13 = vld [vmem:[%s1906_s21 + $0x68] sm:$0xff]  ;;  %1130 = vmatpush1.bf16.xpose.msra.mxu0 %v1129_v8  ;;  %v329_v19 = vld [vmem:[%s1906_s21 + $0x60] sm:$0xff]  ;;  %s1671_s10 = smov [#allocation10]  }
  0x78   : > { %v620_v14 = vld [vmem:[%s1914_s30 + $0x48] sm:$0xff]  ;;  %1256 = vmatprep.subr.bf16.mxu1 %v1255_v7  ;;  %v1131_v16 = vpack.c.bf16 %v330_v13, %v326_v11  ;;  %v619_v20 = vld [vmem:[%s1914_s30 + $0x40] sm:$0xff]  ;;  %v1133_v26 = vpack.c.bf16 %v329_v19, %v325_v18  ;;  %p1580_p12 = pnand %p1579_p10, %p2247_p2  ;;  %s1582_s27 = sshll.u32 %s1671_s10, 4  ;;  %s1583_s27 = int_to_ptr.vmem [resolvable:$false] %s1582_s27 }
  0x79   : > { %v624_v15 = vld [vmem:[%s1914_s30 + $0x68] sm:$0xff]  ;;  %1258 = vmatpush1.bf16.xpose.msra.mxu1 %v1257_v12  ;;  %v623_v21 = vld [vmem:[%s1914_s30 + $0x60] sm:$0xff]  ;;  %s1584_s7 = scalar_lea.vmem %s1583_s27, 1024  ;;  %p1585_p4 = scmp.lt.s32.totalorder %s2172_s29, %s1583_s27 }
  0x7a   : > { %v1259_v17 = vpack.c.bf16 %v624_v15, %v620_v14  ;;  %1132 = vmatprep.subr.bf16.mxu0 %v1131_v16  ;;  %v334_v22 = vld [vmem:[%s1906_s21 + $0x88] sm:$0xff]  ;;  %v1261_v27 = vpack.c.bf16 %v623_v21, %v619_v20  ;;  %v333_v30 = vld [vmem:[%s1906_s21 + $0x80] sm:$0xff]  ;;  %p1581_p0 = pneg %p1580_p12  ;;  %p1586_p3 = scmp.lt.s32.totalorder %s1584_s7, %s1578_s9 }
  0x7b   : > { %v338_v23 = vld [vmem:[%s1906_s21 + $0xa8] sm:$0xff]  ;;  %v337_v31 = vld [vmem:[%s1906_s21 + $0xa0] sm:$0xff] }
  0x7c   : > { %1260 = vmatprep.subr.bf16.mxu1 %v1259_v17  ;;  %v628_v24 = vld [vmem:[%s1914_s30 + $0x88] sm:$0xff]  ;;  %v1135_v28 = vpack.c.bf16 %v338_v23, %v334_v22  ;;  %v627_v32 = vld [vmem:[%s1914_s30 + $0x80] sm:$0xff]  ;;  %v1137_v38 = vpack.c.bf16 %v337_v31, %v333_v30  ;;  %p1587_p5 = por %p1586_p3, %p1585_p4 }
  0x7d   : > { %v632_v25 = vld [vmem:[%s1914_s30 + $0xa8] sm:$0xff]  ;;  %v631_v33 = vld [vmem:[%s1914_s30 + $0xa0] sm:$0xff] }
  0x7e   : > { %v1263_v29 = vpack.c.bf16 %v632_v25, %v628_v24  ;;  %v342_v34 = vld [vmem:[%s1906_s21 + $0xc8] sm:$0xff]  ;;  %v1265_v39 = vpack.c.bf16 %v631_v33, %v627_v32  ;;  %v341_v42 = vld [vmem:[%s1906_s21 + $0xc0] sm:$0xff]  ;;  %p1588_p11 = pnand %p1587_p5, %p1581_p0 }
  0x7f   : > { %1134 = vmatpush1.bf16.xpose.msra.mxu0 %v1133_v26  ;;  %v346_v35 = vld [vmem:[%s1906_s21 + $0xe8] sm:$0xff]  ;;  %v345_v43 = vld [vmem:[%s1906_s21 + $0xe0] sm:$0xff] }
  0x80   : > { %1136 = vmatprep.subr.bf16.mxu0 %v1135_v28  ;;  %v636_v36 = vld [vmem:[%s1914_s30 + $0xc8] sm:$0xff]  ;;  %v1139_v40 = vpack.c.bf16 %v346_v35, %v342_v34  ;;  %v635_v44 = vld [vmem:[%s1914_s30 + $0xc0] sm:$0xff]  ;;  %v1141_v50 = vpack.c.bf16 %v345_v43, %v341_v42 }
  0x81   : > { %1262 = vmatpush1.bf16.xpose.msra.mxu1 %v1261_v27  ;;  %v640_v37 = vld [vmem:[%s1914_s30 + $0xe8] sm:$0xff]  ;;  %v639_v45 = vld [vmem:[%s1914_s30 + $0xe0] sm:$0xff] }
  0x82   : > { %1264 = vmatprep.subr.bf16.mxu1 %v1263_v29  ;;  %v1267_v41 = vpack.c.bf16 %v640_v37, %v636_v36  ;;  %v350_v46 = vld [vmem:[%s1906_s21 + $0x108] sm:$0xff]  ;;  %v1269_v51 = vpack.c.bf16 %v639_v45, %v635_v44  ;;  %v349_v54 = vld [vmem:[%s1906_s21 + $0x100] sm:$0xff] }
  0x83   : > { %v354_v47 = vld [vmem:[%s1906_s21 + $0x128] sm:$0xff]  ;;  %v353_v55 = vld [vmem:[%s1906_s21 + $0x120] sm:$0xff] }
  0x84   : > { %v644_v48 = vld [vmem:[%s1914_s30 + $0x108] sm:$0xff]  ;;  %v1143_v52 = vpack.c.bf16 %v354_v47, %v350_v46  ;;  %v643_v56 = vld [vmem:[%s1914_s30 + $0x100] sm:$0xff]  ;;  %v1145_v62 = vpack.c.bf16 %v353_v55, %v349_v54 }
  0x85   : > { %v648_v49 = vld [vmem:[%s1914_s30 + $0x128] sm:$0xff]  ;;  %v647_v57 = vld [vmem:[%s1914_s30 + $0x120] sm:$0xff] }
  0x86   : > { %v1271_v53 = vpack.c.bf16 %v648_v49, %v644_v48  ;;  %v358_v58 = vld [vmem:[%s1906_s21 + $0x148] sm:$0xff]  ;;  %v1273_v63 = vpack.c.bf16 %v647_v57, %v643_v56  ;;  %v357_v2 = vld [vmem:[%s1906_s21 + $0x140] sm:$0xff] }
  0x87   : > { %1138 = vmatpush1.bf16.xpose.msra.mxu0 %v1137_v38  ;;  %v362_v59 = vld [vmem:[%s1906_s21 + $0x168] sm:$0xff]  ;;  %v361_v3 = vld [vmem:[%s1906_s21 + $0x160] sm:$0xff] }
  0x88   : > { %1140 = vmatprep.subr.bf16.mxu0 %v1139_v40  ;;  %v652_v60 = vld [vmem:[%s1914_s30 + $0x148] sm:$0xff]  ;;  %v1147_v0 = vpack.c.bf16 %v362_v59, %v358_v58  ;;  %v651_v4 = vld [vmem:[%s1914_s30 + $0x140] sm:$0xff]  ;;  %v1149_v10 = vpack.c.bf16 %v361_v3, %v357_v2 }
  0x89   : > { %1266 = vmatpush1.bf16.xpose.msra.mxu1 %v1265_v39  ;;  %v656_v61 = vld [vmem:[%s1914_s30 + $0x168] sm:$0xff]  ;;  %v655_v5 = vld [vmem:[%s1914_s30 + $0x160] sm:$0xff] }
  0x8a   : > { %1268 = vmatprep.subr.bf16.mxu1 %v1267_v41  ;;  %v1275_v1 = vpack.c.bf16 %v656_v61, %v652_v60  ;;  %v366_v6 = vld [vmem:[%s1906_s21 + $0x188] sm:$0xff]  ;;  %v1277_v11 = vpack.c.bf16 %v655_v5, %v651_v4  ;;  %v365_v15 = vld [vmem:[%s1906_s21 + $0x180] sm:$0xff] }
  0x8b   : > { %v370_v7 = vld [vmem:[%s1906_s21 + $0x1a8] sm:$0xff]  ;;  %v369_v16 = vld [vmem:[%s1906_s21 + $0x1a0] sm:$0xff] }
  0x8c   : > { %v660_v8 = vld [vmem:[%s1914_s30 + $0x188] sm:$0xff]  ;;  %v1151_v12 = vpack.c.bf16 %v370_v7, %v366_v6  ;;  %v659_v17 = vld [vmem:[%s1914_s30 + $0x180] sm:$0xff]  ;;  %v1153_v23 = vpack.c.bf16 %v369_v16, %v365_v15 }
  0x8d   : > { %v664_v9 = vld [vmem:[%s1914_s30 + $0x1a8] sm:$0xff]  ;;  %v663_v18 = vld [vmem:[%s1914_s30 + $0x1a0] sm:$0xff] }
  0x8e   : > { %v1279_v13 = vpack.c.bf16 %v664_v9, %v660_v8  ;;  %v306_v14 = vld [vmem:[#allocation4 + $0x8] sm:$0xff]  ;;  %v1281_v24 = vpack.c.bf16 %v663_v18, %v659_v17  ;;  %v373_v27 = vld [vmem:[%s1906_s21 + $0x1c0] sm:$0xff] }
  0x8f   : > { %1142 = vmatpush1.bf16.xpose.msra.mxu0 %v1141_v50  ;;  %509 = vmatprep.mubr.f32.mxu0 %v306_v14  ;;  %v374_v19 = vld [vmem:[%s1906_s21 + $0x1c8] sm:$0xff]  ;;  %v377_v28 = vld [vmem:[%s1906_s21 + $0x1e0] sm:$0xff] }
  0x90   : > { %1144 = vmatprep.subr.bf16.mxu0 %v1143_v52  ;;  %803 = vmatprep.mubr.f32.mxu1 %v306_v14  ;;  %v378_v20 = vld [vmem:[%s1906_s21 + $0x1e8] sm:$0xff]  ;;  %v667_v29 = vld [vmem:[%s1914_s30 + $0x1c0] sm:$0xff]  ;;  %v1157_v35 = vpack.c.bf16 %v377_v28, %v373_v27 }
  0x91   : > { %1270 = vmatpush1.bf16.xpose.msra.mxu1 %v1269_v51  ;;  %v668_v21 = vld [vmem:[%s1914_s30 + $0x1c8] sm:$0xff]  ;;  %v1155_v25 = vpack.c.bf16 %v378_v20, %v374_v19  ;;  %v671_v30 = vld [vmem:[%s1914_s30 + $0x1e0] sm:$0xff] }
  0x92   : > { %1272 = vmatprep.subr.bf16.mxu1 %v1271_v53  ;;  %v672_v22 = vld [vmem:[%s1914_s30 + $0x1e8] sm:$0xff]  ;;  %v1285_v36 = vpack.c.bf16 %v671_v30, %v667_v29  ;;  %v381_v39 = vld [vmem:[%s1906_s21 + $0x200] sm:$0xff] }
  0x93   : > { %v1283_v26 = vpack.c.bf16 %v672_v22, %v668_v21  ;;  %v382_v31 = vld [vmem:[%s1906_s21 + $0x208] sm:$0xff]  ;;  %v385_v40 = vld [vmem:[%s1906_s21 + $0x220] sm:$0xff] }
  0x94   : > { %v386_v32 = vld [vmem:[%s1906_s21 + $0x228] sm:$0xff]  ;;  %v675_v41 = vld [vmem:[%s1914_s30 + $0x200] sm:$0xff]  ;;  %v1161_v47 = vpack.c.bf16 %v385_v40, %v381_v39 }
  0x95   : > { %v676_v33 = vld [vmem:[%s1914_s30 + $0x208] sm:$0xff]  ;;  %v1159_v37 = vpack.c.bf16 %v386_v32, %v382_v31  ;;  %v679_v42 = vld [vmem:[%s1914_s30 + $0x220] sm:$0xff] }
  0x96   : > { %v680_v34 = vld [vmem:[%s1914_s30 + $0x228] sm:$0xff]  ;;  %v1289_v48 = vpack.c.bf16 %v679_v42, %v675_v41  ;;  %v389_v51 = vld [vmem:[%s1906_s21 + $0x240] sm:$0xff] }
  0x97   : > { %1146 = vmatpush1.bf16.xpose.msra.mxu0 %v1145_v62  ;;  %v1287_v38 = vpack.c.bf16 %v680_v34, %v676_v33  ;;  %v390_v43 = vld [vmem:[%s1906_s21 + $0x248] sm:$0xff]  ;;  %v393_v52 = vld [vmem:[%s1906_s21 + $0x260] sm:$0xff] }
  0x98   : > { %1148 = vmatprep.subr.bf16.mxu0 %v1147_v0  ;;  %v394_v44 = vld [vmem:[%s1906_s21 + $0x268] sm:$0xff]  ;;  %v683_v53 = vld [vmem:[%s1914_s30 + $0x240] sm:$0xff]  ;;  %v1165_v59 = vpack.c.bf16 %v393_v52, %v389_v51 }
  0x99   : > { %1274 = vmatpush1.bf16.xpose.msra.mxu1 %v1273_v63  ;;  %v684_v45 = vld [vmem:[%s1914_s30 + $0x248] sm:$0xff]  ;;  %v1163_v49 = vpack.c.bf16 %v394_v44, %v390_v43  ;;  %v687_v54 = vld [vmem:[%s1914_s30 + $0x260] sm:$0xff] }
  0x9a   : > { %1276 = vmatprep.subr.bf16.mxu1 %v1275_v1  ;;  %v688_v46 = vld [vmem:[%s1914_s30 + $0x268] sm:$0xff]  ;;  %v1293_v60 = vpack.c.bf16 %v687_v54, %v683_v53  ;;  %v397_v63 = vld [vmem:[%s1906_s21 + $0x280] sm:$0xff] }
  0x9b   : > { %v1291_v50 = vpack.c.bf16 %v688_v46, %v684_v45  ;;  %v398_v55 = vld [vmem:[%s1906_s21 + $0x288] sm:$0xff]  ;;  %v401_v0 = vld [vmem:[%s1906_s21 + $0x2a0] sm:$0xff] }
  0x9c   : > { %v402_v56 = vld [vmem:[%s1906_s21 + $0x2a8] sm:$0xff]  ;;  %v691_v1 = vld [vmem:[%s1914_s30 + $0x280] sm:$0xff]  ;;  %v1169_v7 = vpack.c.bf16 %v401_v0, %v397_v63  ;;  %v320_v63 = vld [vmem:[%s1906_s21 + $0x18] sm:$0xff] }
  0x9d   : > { %v692_v57 = vld [vmem:[%s1914_s30 + $0x288] sm:$0xff]  ;;  %v1167_v61 = vpack.c.bf16 %v402_v56, %v398_v55  ;;  %v695_v2 = vld [vmem:[%s1914_s30 + $0x2a0] sm:$0xff]  ;;  %v324_v0 = vld [vmem:[%s1906_s21 + $0x38] sm:$0xff] }
  0x9e   : > { %v696_v58 = vld [vmem:[%s1914_s30 + $0x2a8] sm:$0xff]  ;;  %v1297_v8 = vpack.c.bf16 %v695_v2, %v691_v1  ;;  %v703_v14 = vld [vmem:[%s1914_s30 + $0x2e0] sm:$0xff]  ;;  %v614_v1 = vld [vmem:[%s1914_s30 + $0x18] sm:$0xff] }
  0x9f   : > { %1150 = vmatpush1.bf16.xpose.msra.mxu0 %v1149_v10  ;;  %v1295_v62 = vpack.c.bf16 %v696_v58, %v692_v57  ;;  %v406_v3 = vld [vmem:[%s1906_s21 + $0x2c8] sm:$0xff]  ;;  %v618_v2 = vld [vmem:[%s1914_s30 + $0x38] sm:$0xff] }
  0xa0   : > { %1152 = vmatprep.subr.bf16.mxu0 %v1151_v12  ;;  %v410_v4 = vld [vmem:[%s1906_s21 + $0x2e8] sm:$0xff]  ;;  %v409_v12 = vld [vmem:[%s1906_s21 + $0x2e0] sm:$0xff] }
  0xa1   : > { %1278 = vmatpush1.bf16.xpose.msra.mxu1 %v1277_v11  ;;  %v700_v5 = vld [vmem:[%s1914_s30 + $0x2c8] sm:$0xff]  ;;  %v1171_v9 = vpack.c.bf16 %v410_v4, %v406_v3  ;;  %v405_v11 = vld [vmem:[%s1906_s21 + $0x2c0] sm:$0xff] }
  0xa2   : > { %1280 = vmatprep.subr.bf16.mxu1 %v1279_v13  ;;  %v704_v6 = vld [vmem:[%s1914_s30 + $0x2e8] sm:$0xff]  ;;  %v699_v13 = vld [vmem:[%s1914_s30 + $0x2c0] sm:$0xff]  ;;  %v1173_v19 = vpack.c.bf16 %v409_v12, %v405_v11  ;;  %v328_v11 = vld [vmem:[%s1906_s21 + $0x58] sm:$0xff] }
  0xa3   : > { %v1299_v10 = vpack.c.bf16 %v704_v6, %v700_v5  ;;  %v414_v15 = vld [vmem:[%s1906_s21 + $0x308] sm:$0xff]  ;;  %v1301_v20 = vpack.c.bf16 %v703_v14, %v699_v13  ;;  %v1191_v5 = vpack.c.bf16 %v324_v0, %v320_v63  ;;  %v1319_v6 = vpack.c.bf16 %v618_v2, %v614_v1  ;;  %v332_v12 = vld [vmem:[%s1906_s21 + $0x78] sm:$0xff] }
  0xa4   : > { %v418_v16 = vld [vmem:[%s1906_s21 + $0x328] sm:$0xff]  ;;  %v622_v13 = vld [vmem:[%s1914_s30 + $0x58] sm:$0xff] }
  0xa5   : > { %v708_v17 = vld [vmem:[%s1914_s30 + $0x308] sm:$0xff]  ;;  %v1175_v21 = vpack.c.bf16 %v418_v16, %v414_v15  ;;  %v626_v14 = vld [vmem:[%s1914_s30 + $0x78] sm:$0xff]  ;;  %v305_v15 = vld [vmem:[#allocation4] sm:$0xff] }
  0xa6   : > { %v712_v18 = vld [vmem:[%s1914_s30 + $0x328] sm:$0xff]  ;;  %v360_v63 = vld [vmem:[%s1906_s21 + $0x158] sm:$0xff] }
  0xa7   : > { %1154 = vmatpush1.bf16.xpose.msra.mxu0 %v1153_v23  ;;  %v1303_v22 = vpack.c.bf16 %v712_v18, %v708_v17  ;;  %v413_v23 = vld [vmem:[%s1906_s21 + $0x300] sm:$0xff]  ;;  %v422_v27 = vld [vmem:[%s1906_s21 + $0x348] sm:$0xff]  ;;  %v1195_v18 = vpack.c.bf16 %v332_v12, %v328_v11  ;;  %v364_v0 = vld [vmem:[%s1906_s21 + $0x178] sm:$0xff] }
  0xa8   : > { %1156 = vmatprep.subr.bf16.mxu0 %v1155_v25  ;;  %v707_v25 = vld [vmem:[%s1914_s30 + $0x300] sm:$0xff]  ;;  %v426_v28 = vld [vmem:[%s1906_s21 + $0x368] sm:$0xff]  ;;  %v654_v1 = vld [vmem:[%s1914_s30 + $0x158] sm:$0xff] }
  0xa9   : > { %1282 = vmatpush1.bf16.xpose.msra.mxu1 %v1281_v24  ;;  %v417_v24 = vld [vmem:[%s1906_s21 + $0x320] sm:$0xff]  ;;  %v716_v29 = vld [vmem:[%s1914_s30 + $0x348] sm:$0xff]  ;;  %v1179_v33 = vpack.c.bf16 %v426_v28, %v422_v27  ;;  %v336_v27 = vld [vmem:[%s1906_s21 + $0x98] sm:$0xff] }
  0xaa   : > { %1284 = vmatprep.subr.bf16.mxu1 %v1283_v26  ;;  %v711_v26 = vld [vmem:[%s1914_s30 + $0x320] sm:$0xff]  ;;  %v720_v30 = vld [vmem:[%s1914_s30 + $0x368] sm:$0xff]  ;;  %v1177_v31 = vpack.c.bf16 %v417_v24, %v413_v23  ;;  %v331_v23 = vld [vmem:[%s1906_s21 + $0x70] sm:$0xff] }
  0xab   : > { %v1305_v32 = vpack.c.bf16 %v711_v26, %v707_v25  ;;  %v1307_v34 = vpack.c.bf16 %v720_v30, %v716_v29  ;;  %v430_v39 = vld [vmem:[%s1906_s21 + $0x388] sm:$0xff]  ;;  %v621_v24 = vld [vmem:[%s1914_s30 + $0x50] sm:$0xff]  ;;  %v308_v25 = vld [vmem:[#allocation4 + $0x18] sm:$0xff] }
  0xac   : > { %v434_v40 = vld [vmem:[%s1906_s21 + $0x3a8] sm:$0xff]  ;;  %v625_v26 = vld [vmem:[%s1914_s30 + $0x70] sm:$0xff]  ;;  %v340_v28 = vld [vmem:[%s1906_s21 + $0xb8] sm:$0xff] }
  0xad   : > { %v724_v41 = vld [vmem:[%s1914_s30 + $0x388] sm:$0xff]  ;;  %v1183_v45 = vpack.c.bf16 %v434_v40, %v430_v39  ;;  %v630_v29 = vld [vmem:[%s1914_s30 + $0x98] sm:$0xff] }
  0xae   : > { %v728_v42 = vld [vmem:[%s1914_s30 + $0x3a8] sm:$0xff]  ;;  %v634_v30 = vld [vmem:[%s1914_s30 + $0xb8] sm:$0xff] }
  0xaf   : > { %1158 = vmatpush1.bf16.xpose.msra.mxu0 %v1157_v35  ;;  %v421_v35 = vld [vmem:[%s1906_s21 + $0x340] sm:$0xff]  ;;  %v1311_v46 = vpack.c.bf16 %v728_v42, %v724_v41  ;;  %v438_v51 = vld [vmem:[%s1906_s21 + $0x3c8] sm:$0xff]  ;;  %v344_v39 = vld [vmem:[%s1906_s21 + $0xd8] sm:$0xff] }
  0xb0   : > { %1160 = vmatprep.subr.bf16.mxu0 %v1159_v37  ;;  %v715_v37 = vld [vmem:[%s1914_s30 + $0x340] sm:$0xff]  ;;  %v442_v52 = vld [vmem:[%s1906_s21 + $0x3e8] sm:$0xff]  ;;  %v348_v40 = vld [vmem:[%s1906_s21 + $0xf8] sm:$0xff] }
  0xb1   : > { %1286 = vmatpush1.bf16.xpose.msra.mxu1 %v1285_v36  ;;  %v425_v36 = vld [vmem:[%s1906_s21 + $0x360] sm:$0xff]  ;;  %v732_v53 = vld [vmem:[%s1914_s30 + $0x3c8] sm:$0xff]  ;;  %v1187_v57 = vpack.c.bf16 %v442_v52, %v438_v51  ;;  %v638_v41 = vld [vmem:[%s1914_s30 + $0xd8] sm:$0xff] }
  0xb2   : > { %1288 = vmatprep.subr.bf16.mxu1 %v1287_v38  ;;  %v719_v38 = vld [vmem:[%s1914_s30 + $0x360] sm:$0xff]  ;;  %v1181_v43 = vpack.c.bf16 %v425_v36, %v421_v35  ;;  %v736_v54 = vld [vmem:[%s1914_s30 + $0x3e8] sm:$0xff]  ;;  %v335_v35 = vld [vmem:[%s1906_s21 + $0x90] sm:$0xff] }
  0xb3   : > { %v1309_v44 = vpack.c.bf16 %v719_v38, %v715_v37  ;;  %v1315_v58 = vpack.c.bf16 %v736_v54, %v732_v53  ;;  %v339_v36 = vld [vmem:[%s1906_s21 + $0xb0] sm:$0xff]  ;;  %v642_v42 = vld [vmem:[%s1914_s30 + $0xf8] sm:$0xff] }
  0xb4   : > { %v629_v37 = vld [vmem:[%s1914_s30 + $0x90] sm:$0xff]  ;;  %v352_v51 = vld [vmem:[%s1906_s21 + $0x118] sm:$0xff] }
  0xb5   : > { %v633_v38 = vld [vmem:[%s1914_s30 + $0xb0] sm:$0xff]  ;;  %v356_v52 = vld [vmem:[%s1906_s21 + $0x138] sm:$0xff] }
  0xb6   : > { %v646_v53 = vld [vmem:[%s1914_s30 + $0x118] sm:$0xff] }
  0xb7   : > { %1162 = vmatpush1.bf16.xpose.msra.mxu0 %v1161_v47  ;;  %v429_v47 = vld [vmem:[%s1906_s21 + $0x380] sm:$0xff]  ;;  %v650_v54 = vld [vmem:[%s1914_s30 + $0x138] sm:$0xff] }
  0xb8   : > { %1164 = vmatprep.subr.bf16.mxu0 %v1163_v49  ;;  %v723_v49 = vld [vmem:[%s1914_s30 + $0x380] sm:$0xff]  ;;  %v658_v2 = vld [vmem:[%s1914_s30 + $0x178] sm:$0xff] }
  0xb9   : > { %1290 = vmatpush1.bf16.xpose.msra.mxu1 %v1289_v48  ;;  %v433_v48 = vld [vmem:[%s1906_s21 + $0x3a0] sm:$0xff]  ;;  %v368_v11 = vld [vmem:[%s1906_s21 + $0x198] sm:$0xff] }
  0xba   : > { %1292 = vmatprep.subr.bf16.mxu1 %v1291_v50  ;;  %v727_v50 = vld [vmem:[%s1914_s30 + $0x3a0] sm:$0xff]  ;;  %v1185_v55 = vpack.c.bf16 %v433_v48, %v429_v47  ;;  %v343_v47 = vld [vmem:[%s1906_s21 + $0xd0] sm:$0xff]  ;;  %v372_v12 = vld [vmem:[%s1906_s21 + $0x1b8] sm:$0xff] }
  0xbb   : > { %v1313_v56 = vpack.c.bf16 %v727_v50, %v723_v49  ;;  %v347_v48 = vld [vmem:[%s1906_s21 + $0xf0] sm:$0xff] }
  0xbc   : > { %v637_v49 = vld [vmem:[%s1914_s30 + $0xd0] sm:$0xff] }
  0xbd   : > { %v641_v50 = vld [vmem:[%s1914_s30 + $0xf0] sm:$0xff] }
  0xbf   : > { %1166 = vmatpush1.bf16.xpose.msra.mxu0 %v1165_v59  ;;  %v437_v59 = vld [vmem:[%s1906_s21 + $0x3c0] sm:$0xff] }
  0xc0   : > { %1168 = vmatprep.subr.bf16.mxu0 %v1167_v61  ;;  %v731_v61 = vld [vmem:[%s1914_s30 + $0x3c0] sm:$0xff] }
  0xc1   : > { %1294 = vmatpush1.bf16.xpose.msra.mxu1 %v1293_v60  ;;  %v441_v60 = vld [vmem:[%s1906_s21 + $0x3e0] sm:$0xff] }
  0xc2   : > { %1296 = vmatprep.subr.bf16.mxu1 %v1295_v62  ;;  %v735_v62 = vld [vmem:[%s1914_s30 + $0x3e0] sm:$0xff]  ;;  %v1189_v3 = vpack.c.bf16 %v441_v60, %v437_v59  ;;  %v351_v59 = vld [vmem:[%s1906_s21 + $0x110] sm:$0xff] }
  0xc3   : > { %v1317_v4 = vpack.c.bf16 %v735_v62, %v731_v61  ;;  %v355_v60 = vld [vmem:[%s1906_s21 + $0x130] sm:$0xff] }
  0xc4   : > { %v645_v61 = vld [vmem:[%s1914_s30 + $0x110] sm:$0xff] }
  0xc5   : > { %v649_v62 = vld [vmem:[%s1914_s30 + $0x130] sm:$0xff] }
  0xc7   : > { %1170 = vmatpush1.bf16.xpose.msra.mxu0 %v1169_v7  ;;  %v319_v7 = vld [vmem:[%s1906_s21 + $0x10] sm:$0xff] }
  0xc8   : > { %1172 = vmatprep.subr.bf16.mxu0 %v1171_v9  ;;  %v613_v9 = vld [vmem:[%s1914_s30 + $0x10] sm:$0xff] }
  0xc9   : > { %1298 = vmatpush1.bf16.xpose.msra.mxu1 %v1297_v8  ;;  %v323_v8 = vld [vmem:[%s1906_s21 + $0x30] sm:$0xff] }
  0xca   : > { %1300 = vmatprep.subr.bf16.mxu1 %v1299_v10  ;;  %v617_v10 = vld [vmem:[%s1914_s30 + $0x30] sm:$0xff]  ;;  %v1193_v16 = vpack.c.bf16 %v323_v8, %v319_v7 }
  0xcb   : > { %v1321_v17 = vpack.c.bf16 %v617_v10, %v613_v9  ;;  %v359_v7 = vld [vmem:[%s1906_s21 + $0x150] sm:$0xff] }
  0xcc   : > { %v363_v8 = vld [vmem:[%s1906_s21 + $0x170] sm:$0xff] }
  0xcd   : > { %v653_v9 = vld [vmem:[%s1914_s30 + $0x150] sm:$0xff] }
  0xce   : > { %v657_v10 = vld [vmem:[%s1914_s30 + $0x170] sm:$0xff] }
  0xcf   : > { %1174 = vmatpush1.bf16.xpose.msra.mxu0 %v1173_v19  ;;  %v1323_v19 = vpack.c.bf16 %v626_v14, %v622_v13  ;;  %v662_v13 = vld [vmem:[%s1914_s30 + $0x198] sm:$0xff] }
  0xd0   : > { %1176 = vmatprep.subr.bf16.mxu0 %v1175_v21  ;;  %v327_v21 = vld [vmem:[%s1906_s21 + $0x50] sm:$0xff]  ;;  %v666_v14 = vld [vmem:[%s1914_s30 + $0x1b8] sm:$0xff] }
  0xd1   : > { %1302 = vmatpush1.bf16.xpose.msra.mxu1 %v1301_v20  ;;  %v310_v20 = vld [vmem:[#allocation4 + $0x28] sm:$0xff] }
  0xd2   : > { %1304 = vmatprep.subr.bf16.mxu1 %v1303_v22  ;;  %v309_v22 = vld [vmem:[#allocation4 + $0x20] sm:$0xff] }
  0xd7   : > { %1178 = vmatpush1.bf16.xpose.msra.mxu0 %v1177_v31  ;;  %v1197_v31 = vpack.c.bf16 %v331_v23, %v327_v21  ;;  %v661_v21 = vld [vmem:[%s1914_s30 + $0x190] sm:$0xff]  ;;  %v376_v23 = vld [vmem:[%s1906_s21 + $0x1d8] sm:$0xff] }
  0xd8   : > { %1180 = vmatprep.subr.bf16.mxu0 %v1179_v33  ;;  %v1199_v33 = vpack.c.bf16 %v340_v28, %v336_v27 }
  0xd9   : > { %1306 = vmatpush1.bf16.xpose.msra.mxu1 %v1305_v32  ;;  %v1325_v32 = vpack.c.bf16 %v625_v26, %v621_v24  ;;  %v380_v24 = vld [vmem:[%s1906_s21 + $0x1f8] sm:$0xff] }
  0xda   : > { %1308 = vmatprep.subr.bf16.mxu1 %v1307_v34  ;;  %v1327_v34 = vpack.c.bf16 %v634_v30, %v630_v29  ;;  %v674_v26 = vld [vmem:[%s1914_s30 + $0x1f8] sm:$0xff]  ;;  %v1219_v29 = vpack.c.bf16 %v380_v24, %v376_v23 }
  0xdf   : > { %1182 = vmatpush1.bf16.xpose.msra.mxu0 %v1181_v43  ;;  %v1201_v43 = vpack.c.bf16 %v339_v36, %v335_v35  ;;  %v384_v35 = vld [vmem:[%s1906_s21 + $0x218] sm:$0xff] }
  0xe0   : > { %1184 = vmatprep.subr.bf16.mxu0 %v1183_v45  ;;  %v1203_v45 = vpack.c.bf16 %v348_v40, %v344_v39  ;;  %v388_v36 = vld [vmem:[%s1906_s21 + $0x238] sm:$0xff] }
  0xe1   : > { %1310 = vmatpush1.bf16.xpose.msra.mxu1 %v1309_v44  ;;  %v1329_v44 = vpack.c.bf16 %v633_v38, %v629_v37  ;;  %v678_v37 = vld [vmem:[%s1914_s30 + $0x218] sm:$0xff] }
  0xe2   : > { %1312 = vmatprep.subr.bf16.mxu1 %v1311_v46  ;;  %v1331_v46 = vpack.c.bf16 %v642_v42, %v638_v41  ;;  %v682_v38 = vld [vmem:[%s1914_s30 + $0x238] sm:$0xff]  ;;  %v1223_v41 = vpack.c.bf16 %v388_v36, %v384_v35 }
  0xe3   : > { %v1351_v42 = vpack.c.bf16 %v682_v38, %v678_v37 }
  0xe7   : > { %1186 = vmatpush1.bf16.xpose.msra.mxu0 %v1185_v55  ;;  %v1205_v55 = vpack.c.bf16 %v347_v48, %v343_v47  ;;  %v392_v47 = vld [vmem:[%s1906_s21 + $0x258] sm:$0xff] }
  0xe8   : > { %1188 = vmatprep.subr.bf16.mxu0 %v1187_v57  ;;  %v1207_v57 = vpack.c.bf16 %v356_v52, %v352_v51  ;;  %v396_v48 = vld [vmem:[%s1906_s21 + $0x278] sm:$0xff] }
  0xe9   : > { %1314 = vmatpush1.bf16.xpose.msra.mxu1 %v1313_v56  ;;  %v1333_v56 = vpack.c.bf16 %v641_v50, %v637_v49  ;;  %v686_v49 = vld [vmem:[%s1914_s30 + $0x258] sm:$0xff] }
  0xea   : > { %1316 = vmatprep.subr.bf16.mxu1 %v1315_v58  ;;  %v1335_v58 = vpack.c.bf16 %v650_v54, %v646_v53  ;;  %v690_v50 = vld [vmem:[%s1914_s30 + $0x278] sm:$0xff]  ;;  %v1227_v53 = vpack.c.bf16 %v396_v48, %v392_v47 }
  0xeb   : > { %v1355_v54 = vpack.c.bf16 %v690_v50, %v686_v49 }
  0xef   : > { %1190 = vmatpush1.bf16.xpose.msra.mxu0 %v1189_v3  ;;  %v1209_v3 = vpack.c.bf16 %v355_v60, %v351_v59  ;;  %v400_v59 = vld [vmem:[%s1906_s21 + $0x298] sm:$0xff] }
  0xf0   : > { %1192 = vmatprep.subr.bf16.mxu0 %v1191_v5  ;;  %v1211_v5 = vpack.c.bf16 %v364_v0, %v360_v63  ;;  %v404_v60 = vld [vmem:[%s1906_s21 + $0x2b8] sm:$0xff] }
  0xf1   : > { %1318 = vmatpush1.bf16.xpose.msra.mxu1 %v1317_v4  ;;  %v1337_v4 = vpack.c.bf16 %v649_v62, %v645_v61  ;;  %v694_v61 = vld [vmem:[%s1914_s30 + $0x298] sm:$0xff] }
  0xf2   : > { %1320 = vmatprep.subr.bf16.mxu1 %v1319_v6  ;;  %v1339_v6 = vpack.c.bf16 %v658_v2, %v654_v1  ;;  %v698_v62 = vld [vmem:[%s1914_s30 + $0x2b8] sm:$0xff]  ;;  %v1231_v1 = vpack.c.bf16 %v404_v60, %v400_v59 }
  0xf3   : > { %v1359_v2 = vpack.c.bf16 %v698_v62, %v694_v61 }
  0xf6   : > { %510 = vmatmul.mubr.f32.vlgmr.msra.gmra.mrb[0].mxu0 %v305_v15 }
  0xf7   : > { %1194 = vmatpush1.bf16.xpose.msra.mxu0 %v1193_v16  ;;  %515 = vmatprep.mubr.f32.mxu0 %v310_v20  ;;  %v1341_v16 = vpack.c.bf16 %v657_v10, %v653_v9  ;;  %v702_v9 = vld [vmem:[%s1914_s30 + $0x2d8] sm:$0xff] }
  0xf8   : > { %804 = vmatmul.mubr.f32.vlgmr.msra.gmra.mrb[0].mxu1 %v305_v15  ;;  %1196 = vmatprep.subr.bf16.mxu0 %v1195_v18  ;;  %v1213_v15 = vpack.c.bf16 %v363_v8, %v359_v7  ;;  %v1343_v18 = vpack.c.bf16 %v666_v14, %v662_v13  ;;  %v408_v7 = vld [vmem:[%s1906_s21 + $0x2d8] sm:$0xff] }
  0xf9   : > { %1322 = vmatpush1.bf16.xpose.msra.mxu1 %v1321_v17  ;;  %809 = vmatprep.mubr.f32.mxu1 %v310_v20  ;;  %v1215_v17 = vpack.c.bf16 %v372_v12, %v368_v11  ;;  %v371_v20 = vld [vmem:[%s1906_s21 + $0x1b0] sm:$0xff]  ;;  %v412_v8 = vld [vmem:[%s1906_s21 + $0x2f8] sm:$0xff] }
  0xfa   : > { %1324 = vmatprep.subr.bf16.mxu1 %v1323_v19  ;;  %516 = vmatmul.mubr.f32.gmra.mrb[2].mxu0 %v309_v22  ;;  %v367_v19 = vld [vmem:[%s1906_s21 + $0x190] sm:$0xff]  ;;  %v706_v10 = vld [vmem:[%s1914_s30 + $0x2f8] sm:$0xff]  ;;  %v1235_v13 = vpack.c.bf16 %v412_v8, %v408_v7 }
  0xfb   : > { %586 = vmatprep.mubr.f32.mxu0 %v308_v25  ;;  %v1217_v27 = vpack.c.bf16 %v371_v20, %v367_v19  ;;  %v1363_v14 = vpack.c.bf16 %v706_v10, %v702_v9  ;;  %v416_v19 = vld [vmem:[%s1906_s21 + $0x318] sm:$0xff]  ;;  %v311_v7 = vld [vmem:[#allocation4 + $0x30] sm:$0xff] }
  0xfc   : > { %810 = vmatmul.mubr.f32.gmra.mrb[2].mxu1 %v309_v22  ;;  %v665_v22 = vld [vmem:[%s1914_s30 + $0x1b0] sm:$0xff]  ;;  %v420_v20 = vld [vmem:[%s1906_s21 + $0x338] sm:$0xff] }
  0xfd   : > { %880 = vmatprep.mubr.f32.mxu1 %v308_v25  ;;  %v670_v25 = vld [vmem:[%s1914_s30 + $0x1d8] sm:$0xff]  ;;  %v1345_v28 = vpack.c.bf16 %v665_v22, %v661_v21 }
  0xfe   : > { %v1347_v30 = vpack.c.bf16 %v674_v26, %v670_v25  ;;  %v710_v21 = vld [vmem:[%s1914_s30 + $0x318] sm:$0xff]  ;;  %v1239_v25 = vpack.c.bf16 %v420_v20, %v416_v19 }
  0xff   : > { %1198 = vmatpush1.bf16.xpose.msra.mxu0 %v1197_v31  ;;  %v375_v31 = vld [vmem:[%s1906_s21 + $0x1d0] sm:$0xff]  ;;  %v714_v22 = vld [vmem:[%s1914_s30 + $0x338] sm:$0xff] }
 0x100   : > { %1200 = vmatprep.subr.bf16.mxu0 %v1199_v33  ;;  %v669_v33 = vld [vmem:[%s1914_s30 + $0x1d0] sm:$0xff]  ;;  %v1367_v26 = vpack.c.bf16 %v714_v22, %v710_v21 }
 0x101   : > { %1326 = vmatpush1.bf16.xpose.msra.mxu1 %v1325_v32  ;;  %v379_v32 = vld [vmem:[%s1906_s21 + $0x1f0] sm:$0xff] }
 0x102   : > { %1328 = vmatprep.subr.bf16.mxu1 %v1327_v34  ;;  %v673_v34 = vld [vmem:[%s1914_s30 + $0x1f0] sm:$0xff]  ;;  %v1221_v39 = vpack.c.bf16 %v379_v32, %v375_v31  ;;  %v424_v31 = vld [vmem:[%s1906_s21 + $0x358] sm:$0xff] }
 0x103   : > { %v1349_v40 = vpack.c.bf16 %v673_v34, %v669_v33  ;;  %v428_v32 = vld [vmem:[%s1906_s21 + $0x378] sm:$0xff] }
 0x104   : > { %v718_v33 = vld [vmem:[%s1914_s30 + $0x358] sm:$0xff]  ;;  %v1243_v37 = vpack.c.bf16 %v428_v32, %v424_v31 }
 0x105   : > { %v722_v34 = vld [vmem:[%s1914_s30 + $0x378] sm:$0xff] }
 0x106   : > { %v1371_v38 = vpack.c.bf16 %v722_v34, %v718_v33 }
 0x107   : > { %1202 = vmatpush1.bf16.xpose.msra.mxu0 %v1201_v43  ;;  %v383_v43 = vld [vmem:[%s1906_s21 + $0x210] sm:$0xff] }
 0x108   : > { %1204 = vmatprep.subr.bf16.mxu0 %v1203_v45  ;;  %v677_v45 = vld [vmem:[%s1914_s30 + $0x210] sm:$0xff] }
 0x109   : > { %1330 = vmatpush1.bf16.xpose.msra.mxu1 %v1329_v44  ;;  %v387_v44 = vld [vmem:[%s1906_s21 + $0x230] sm:$0xff] }
 0x10a   : > { %1332 = vmatprep.subr.bf16.mxu1 %v1331_v46  ;;  %v681_v46 = vld [vmem:[%s1914_s30 + $0x230] sm:$0xff]  ;;  %v1225_v51 = vpack.c.bf16 %v387_v44, %v383_v43  ;;  %v432_v43 = vld [vmem:[%s1906_s21 + $0x398] sm:$0xff] }
 0x10b   : > { %v1353_v52 = vpack.c.bf16 %v681_v46, %v677_v45  ;;  %v436_v44 = vld [vmem:[%s1906_s21 + $0x3b8] sm:$0xff] }
 0x10c   : > { %v726_v45 = vld [vmem:[%s1914_s30 + $0x398] sm:$0xff]  ;;  %v1247_v49 = vpack.c.bf16 %v436_v44, %v432_v43 }
 0x10d   : > { %v730_v46 = vld [vmem:[%s1914_s30 + $0x3b8] sm:$0xff] }
 0x10e   : > { %v1375_v50 = vpack.c.bf16 %v730_v46, %v726_v45 }
 0x10f   : > { %1206 = vmatpush1.bf16.xpose.msra.mxu0 %v1205_v55  ;;  %v391_v55 = vld [vmem:[%s1906_s21 + $0x250] sm:$0xff] }
 0x110   : > { %1208 = vmatprep.subr.bf16.mxu0 %v1207_v57  ;;  %v685_v57 = vld [vmem:[%s1914_s30 + $0x250] sm:$0xff] }
 0x111   : > { %1334 = vmatpush1.bf16.xpose.msra.mxu1 %v1333_v56  ;;  %v395_v56 = vld [vmem:[%s1906_s21 + $0x270] sm:$0xff] }
 0x112   : > { %1336 = vmatprep.subr.bf16.mxu1 %v1335_v58  ;;  %v689_v58 = vld [vmem:[%s1914_s30 + $0x270] sm:$0xff]  ;;  %v1229_v63 = vpack.c.bf16 %v395_v56, %v391_v55  ;;  %v440_v55 = vld [vmem:[%s1906_s21 + $0x3d8] sm:$0xff] }
 0x113   : > { %v1357_v0 = vpack.c.bf16 %v689_v58, %v685_v57  ;;  %v444_v56 = vld [vmem:[%s1906_s21 + $0x3f8] sm:$0xff] }
 0x114   : > { %v734_v57 = vld [vmem:[%s1914_s30 + $0x3d8] sm:$0xff]  ;;  %v1251_v61 = vpack.c.bf16 %v444_v56, %v440_v55 }
 0x115   : > { %v738_v58 = vld [vmem:[%s1914_s30 + $0x3f8] sm:$0xff] }
 0x116   : > { %v1379_v62 = vpack.c.bf16 %v738_v58, %v734_v57 }
 0x117   : > { %1210 = vmatpush1.bf16.xpose.msra.mxu0 %v1209_v3  ;;  %v399_v3 = vld [vmem:[%s1906_s21 + $0x290] sm:$0xff] }
 0x118   : > { %1212 = vmatprep.subr.bf16.mxu0 %v1211_v5  ;;  %v693_v5 = vld [vmem:[%s1914_s30 + $0x290] sm:$0xff] }
 0x119   : > { %1338 = vmatpush1.bf16.xpose.msra.mxu1 %v1337_v4  ;;  %v403_v4 = vld [vmem:[%s1906_s21 + $0x2b0] sm:$0xff] }
 0x11a   : > { %1340 = vmatprep.subr.bf16.mxu1 %v1339_v6  ;;  %v697_v6 = vld [vmem:[%s1914_s30 + $0x2b0] sm:$0xff]  ;;  %v1233_v11 = vpack.c.bf16 %v403_v4, %v399_v3 }
 0x11b   : > { %v1361_v12 = vpack.c.bf16 %v697_v6, %v693_v5  ;;  %v307_v5 = vld [vmem:[#allocation4 + $0x10] sm:$0xff]  ;;  %v312_v6 = vld [vmem:[#allocation4 + $0x38] sm:$0xff] }
 0x11f   : > { %1214 = vmatpush1.bf16.xpose.msra.mxu0 %v1213_v15  ;;  %v407_v15 = vld [vmem:[%s1906_s21 + $0x2d0] sm:$0xff] }
 0x120   : > { %1216 = vmatprep.subr.bf16.mxu0 %v1215_v17  ;;  %v701_v17 = vld [vmem:[%s1914_s30 + $0x2d0] sm:$0xff] }
 0x121   : > { %1342 = vmatpush1.bf16.xpose.msra.mxu1 %v1341_v16  ;;  %v411_v16 = vld [vmem:[%s1906_s21 + $0x2f0] sm:$0xff] }
 0x122   : > { %1344 = vmatprep.subr.bf16.mxu1 %v1343_v18  ;;  %v705_v18 = vld [vmem:[%s1914_s30 + $0x2f0] sm:$0xff]  ;;  %v1237_v23 = vpack.c.bf16 %v411_v16, %v407_v15 }
 0x123   : > { %v1365_v24 = vpack.c.bf16 %v705_v18, %v701_v17 }
 0x127   : > { %1218 = vmatpush1.bf16.xpose.msra.mxu0 %v1217_v27  ;;  %v415_v27 = vld [vmem:[%s1906_s21 + $0x310] sm:$0xff] }
 0x128   : > { %1220 = vmatprep.subr.bf16.mxu0 %v1219_v29  ;;  %v709_v29 = vld [vmem:[%s1914_s30 + $0x310] sm:$0xff] }
 0x129   : > { %1346 = vmatpush1.bf16.xpose.msra.mxu1 %v1345_v28  ;;  %v419_v28 = vld [vmem:[%s1906_s21 + $0x330] sm:$0xff] }
 0x12a   : > { %1348 = vmatprep.subr.bf16.mxu1 %v1347_v30  ;;  %v713_v30 = vld [vmem:[%s1914_s30 + $0x330] sm:$0xff]  ;;  %v1241_v35 = vpack.c.bf16 %v419_v28, %v415_v27 }
 0x12b   : > { %v1369_v36 = vpack.c.bf16 %v713_v30, %v709_v29 }
 0x12f   : > { %1222 = vmatpush1.bf16.xpose.msra.mxu0 %v1221_v39  ;;  %v423_v39 = vld [vmem:[%s1906_s21 + $0x350] sm:$0xff] }
 0x130   : > { %1224 = vmatprep.subr.bf16.mxu0 %v1223_v41  ;;  %v717_v41 = vld [vmem:[%s1914_s30 + $0x350] sm:$0xff] }
 0x131   : > { %1350 = vmatpush1.bf16.xpose.msra.mxu1 %v1349_v40  ;;  %v427_v40 = vld [vmem:[%s1906_s21 + $0x370] sm:$0xff] }
 0x132   : > { %1352 = vmatprep.subr.bf16.mxu1 %v1351_v42  ;;  %v721_v42 = vld [vmem:[%s1914_s30 + $0x370] sm:$0xff]  ;;  %v1245_v47 = vpack.c.bf16 %v427_v40, %v423_v39 }
 0x133   : > { %v1373_v48 = vpack.c.bf16 %v721_v42, %v717_v41 }
 0x137   : > { %1226 = vmatpush1.bf16.xpose.msra.mxu0 %v1225_v51  ;;  %v431_v51 = vld [vmem:[%s1906_s21 + $0x390] sm:$0xff] }
 0x138   : > { %1228 = vmatprep.subr.bf16.mxu0 %v1227_v53  ;;  %v725_v53 = vld [vmem:[%s1914_s30 + $0x390] sm:$0xff] }
 0x139   : > { %1354 = vmatpush1.bf16.xpose.msra.mxu1 %v1353_v52  ;;  %v435_v52 = vld [vmem:[%s1906_s21 + $0x3b0] sm:$0xff] }
 0x13a   : > { %1356 = vmatprep.subr.bf16.mxu1 %v1355_v54  ;;  %v729_v54 = vld [vmem:[%s1914_s30 + $0x3b0] sm:$0xff]  ;;  %v1249_v59 = vpack.c.bf16 %v435_v52, %v431_v51 }
 0x13b   : > { %v1377_v60 = vpack.c.bf16 %v729_v54, %v725_v53 }
 0x13f   : > { %1230 = vmatpush1.bf16.xpose.msra.mxu0 %v1229_v63  ;;  %v439_v63 = vld [vmem:[%s1906_s21 + $0x3d0] sm:$0xff] }
 0x140   : > { %1232 = vmatprep.subr.bf16.mxu0 %v1231_v1  ;;  %v733_v1 = vld [vmem:[%s1914_s30 + $0x3d0] sm:$0xff] }
 0x141   : > { %1358 = vmatpush1.bf16.xpose.msra.mxu1 %v1357_v0  ;;  %v443_v0 = vld [vmem:[%s1906_s21 + $0x3f0] sm:$0xff] }
 0x142   : > { %1360 = vmatprep.subr.bf16.mxu1 %v1359_v2  ;;  %v737_v2 = vld [vmem:[%s1914_s30 + $0x3f0] sm:$0xff]  ;;  %v1253_v3 = vpack.c.bf16 %v443_v0, %v439_v63 }
 0x143   : > { %v1381_v4 = vpack.c.bf16 %v737_v2, %v733_v1 }
 0x147   : > { %1234 = vmatpush1.bf16.xpose.msra.mxu0 %v1233_v11 }
 0x148   : > { %1236 = vmatprep.subr.bf16.mxu0 %v1235_v13 }
 0x149   : > { %1362 = vmatpush1.bf16.xpose.msra.mxu1 %v1361_v12 }
 0x14a   : > { %1364 = vmatprep.subr.bf16.mxu1 %v1363_v14 }
 0x14f   : > { %1238 = vmatpush1.bf16.xpose.msra.mxu0 %v1237_v23 }
 0x150   : > { %1240 = vmatprep.subr.bf16.mxu0 %v1239_v25 }
 0x151   : > { %1366 = vmatpush1.bf16.xpose.msra.mxu1 %v1365_v24 }
 0x152   : > { %1368 = vmatprep.subr.bf16.mxu1 %v1367_v26 }
 0x157   : > { %1242 = vmatpush1.bf16.xpose.msra.mxu0 %v1241_v35 }
 0x158   : > { %1244 = vmatprep.subr.bf16.mxu0 %v1243_v37 }
 0x159   : > { %1370 = vmatpush1.bf16.xpose.msra.mxu1 %v1369_v36 }
 0x15a   : > { %1372 = vmatprep.subr.bf16.mxu1 %v1371_v38 }
 0x15f   : > { %1246 = vmatpush1.bf16.xpose.msra.mxu0 %v1245_v47 }
 0x160   : > { %1248 = vmatprep.subr.bf16.mxu0 %v1247_v49 }
 0x161   : > { %1374 = vmatpush1.bf16.xpose.msra.mxu1 %v1373_v48 }
 0x162   : > { %1376 = vmatprep.subr.bf16.mxu1 %v1375_v50 }
 0x167   : > { %1250 = vmatpush1.bf16.xpose.msra.mxu0 %v1249_v59 }
 0x168   : > { %1252 = vmatprep.subr.bf16.mxu0 %v1251_v61 }
 0x169   : > { %1378 = vmatpush1.bf16.xpose.msra.mxu1 %v1377_v60 }
 0x16a   : > { %1380 = vmatprep.subr.bf16.mxu1 %v1379_v62 }
 0x16f   : > { %1254 = vmatpush1.bf16.xpose.msra.mxu0 %v1253_v3 }
 0x171   : > { %1382 = vmatpush1.bf16.xpose.msra.mxu1 %v1381_v4 }
 0x176   : > { %587 = vmatmul.mubr.f32.vlgmr.msra.gmra.mrb[0].mxu0 %v307_v5 }
 0x177   : > { %592 = vmatprep.mubr.f32.mxu0 %v312_v6 }
 0x178   : > { %881 = vmatmul.mubr.f32.vlgmr.msra.gmra.mrb[0].mxu1 %v307_v5 }
 0x179   : > { %886 = vmatprep.mubr.f32.mxu1 %v312_v6 }
 0x17a   : > { %593 = vmatmul.mubr.f32.gmra.mrb[2].mxu0 %v311_v7 }
 0x17c   : > { %887 = vmatmul.mubr.f32.gmra.mrb[2].mxu1 %v311_v7 }
 0x249   : > { %v588_v8 = vpop.f32.mrb[0].mxu0 }
 0x24a   : > { %v1113_v9 = vmul.f32 -1.442695, %v588_v8  ;;  %v590_v11 = vpop.f32.mrb[1].mxu0 }
 0x24b   : > { %v882_v10 = vpop.f32.mrb[0].mxu1  ;;  %v1114_v12 = vmul.f32 -1.442695, %v590_v11 }
 0x24c   : > { %v884_v13 = vpop.f32.mrb[1].mxu1  ;;  %1474 = vpow2.f32 %v1113_v9 }
 0x24d   : > { %1476 = vpow2.f32 %v1114_v12  ;;  %v594_v14 = vpop.f32.mrb[2].mxu0 }
 0x24e   : > { %v1115_v15 = vmul.f32 -1.442695, %v594_v14  ;;  %v596_v16 = vpop.f32.mrb[3].mxu0 }
 0x24f   : > { %v888_v17 = vpop.f32.mrb[2].mxu1  ;;  %v1116_v18 = vmul.f32 -1.442695, %v596_v16 }
 0x250   : > { %v890_v19 = vpop.f32.mrb[3].mxu1  ;;  %1478 = vpow2.f32 %v1115_v15 }
 0x251   : > { %1480 = vpow2.f32 %v1116_v18 }
 0x256   : > { %v1475_v20 = vpop.eup %1474 }
 0x257   : > { %v1477_v21 = vpop.eup %1476  ;;  %v920_v22 = vadd.f32 1.0, %v1475_v20 }
 0x258   : > { %v921_v23 = vadd.f32 1.0, %v1477_v21 }
 0x259   : > { %1482 = vrcp.f32 %v920_v22 }
 0x25a   : > { %v1479_v24 = vpop.eup %1478  ;;  %1484 = vrcp.f32 %v921_v23 }
 0x25b   : > { %v1481_v25 = vpop.eup %1480  ;;  %v922_v26 = vadd.f32 1.0, %v1479_v24 }
 0x25c   : > { %v923_v27 = vadd.f32 1.0, %v1481_v25 }
 0x25d   : > { %1486 = vrcp.f32 %v922_v26 }
 0x25e   : > { %1488 = vrcp.f32 %v923_v27 }
 0x263   : > { %v1483_v28 = vpop.eup %1482 }
 0x264   : > { %v1485_v29 = vpop.eup %1484  ;;  %v932_v30 = vmul.f32 %v1483_v28, %v588_v8 }
 0x265   : > { %v933_v31 = vmul.f32 %v1485_v29, %v590_v11 }
 0x266   : > { %v940_v32 = vmul.f32 %v932_v30, %v882_v10 }
 0x267   : > { %v1487_v33 = vpop.eup %1486  ;;  %v941_v34 = vmul.f32 %v933_v31, %v884_v13 }
 0x268   : > { %v1489_v35 = vpop.eup %1488  ;;  %944 = vst [vmem:[%s284_s11] sm:$0xff] %v940_v32  ;;  %v934_v36 = vmul.f32 %v1487_v33, %v594_v14 }
 0x269   : > { %945 = vst [vmem:[%s284_s11 + $0x8] sm:$0xff] %v941_v34  ;;  %v935_v37 = vmul.f32 %v1489_v35, %v596_v16 }
 0x26a   : > { %v942_v38 = vmul.f32 %v934_v36, %v888_v17 }
 0x26b   : > { %v943_v39 = vmul.f32 %v935_v37, %v890_v19 }
 0x26c   : > { %946 = vst [vmem:[%s284_s11 + $0x10] sm:$0xff] %v942_v38 }
 0x26d   : > { %947 = vst [vmem:[%s284_s11 + $0x18] sm:$0xff] %v943_v39 }
 0x26e   : > { %1591 = shalt.err (!%p1588_p11)
}
 0x26f   : > { %s1592_s22 = scalar_lea.hbm %s2177_s8, 512  ;;  %s1596_s21 = scalar_lea.hbm %s2229_s3, 1024 }
 0x270   : > { %p1593_p9 = scmp.ne.s32.totalorder %s2177_s8, %s1592_s22  ;;  %p1597_p1 = scmp.lt.u32.totalorder %s2177_s8, %s2229_s3 }
 0x271   : > { %p1598_p7 = scmp.lt.u32.totalorder %s1596_s21, %s1592_s22  ;;  %p1600_p10 = scmp.lt.u32.totalorder %s1592_s22, %s2177_s8 }
 0x272   : > { %p1594_p8 = pnand %p1593_p9, %p2247_p2 }
 0x273   : > { %p1599_p13 = por %p1598_p7, %p1597_p1 }
 0x274   : > { %p1595_p6 = pneg %p1594_p8 }
 0x275   : > { %p1601_p12 = por %p1600_p10, %p1599_p13 }
 0x277   : > { %p1602_p0 = pnand %p1601_p12, %p1595_p6 }
 0x279   : > { %1605 = shalt.err (!%p1602_p0)
}
 0x27a   : > { %s1672_s11 = smov 256   ;;  %s1673_s20 = smov 512  }
 0x27b   : > { %s1674_s23 = smov 16  }
 0x27c   : > { %1399 = dma.vmem_to_hbm [thread:$0]  (%p2247_p2), %s2172_s29, 512, %s2177_s8, %s949_s15, %s1672_s11, %s1673_s20, %s1674_s23  }
 0x27d PF: > { %s980_s26 = sand.u32 1, %s1644_s12   ;;  %p2248_p4 = scmp.ne.s32.totalorder %s2238_s4, 0 }
 0x27e   : > { %p2249_p3 = scmp.ge.s32.totalorder %s1664_s17, 2  ;;  %s981_s9 = scalar_lea.sflag [#allocation6], %s980_s26 }
 0x280   : > { %p1413_p5 = pnand %p2249_p3, %p2248_p4 }
 0x282   : > { %1639 = dma.done.wait (!%p1413_p5), %s981_s9, 512  }
 0x283   : > { %1641 = vsyncadd (!%p1413_p5), %s981_s9, 4294966784  ;;  %s20_s17 = sadd.s32 1, %s1664_s17   ;;  %s2250_s12 = smov %s1648_s13 }
 0x284   : > { %p17_p11 = scmp.ge.s32.totalorder %s20_s17, 4   ;;  %s2251_s13 = smov %s1652_s14 }
 0x285   : > { %s2252_s14 = smov %s1746_s24  ;;  %s2253_s15 = smov %s1660_s16 }
 0x286   : > { %s2254_s16 = smov %s2256_s18  ;;  %19 = sbr.rel (!%p17_p11) target bundleno = 7 (0x7), region = 102 }
 0x28d   :  { %986 = vsyncpa [#allocation5], 1 }
 0x28e   :  { %988 = vsyncpa [#allocation5 + $0x1], 1 }
 0x28f   :  { %989 = vsyncpa [#allocation8], 1 }
 0x290   :  { %991 = vsyncpa [#allocation8 + $0x1], 1 }
 0x291   :  { %992 = vsyncpa [#allocation6], 1 }
 0x292   :  { %994 = vsyncpa [#allocation6 + $0x1], 1 }

</bundles_post_ra>
